<compile_context>
chip_gen: v6e
topology: v6e:2x2x1
jax: 0.10.0
libtpu: 0.0.40
codegen_flags: <defaults>
</compile_context>

<pallas_src>
import jax
import jax.numpy as jnp
from jax import lax
from jax.experimental import pallas as pl
from jax.experimental.pallas import tpu as pltpu

EPS = 1e-5
_FPN_SELECTED = (1, 3, 6, 10, 13)


# ----------------------------------------------------------------------------
# helpers
# ----------------------------------------------------------------------------
def _make_divisible(v, divisor=8, min_value=None):
    if min_value is None:
        min_value = divisor
    new_v = max(min_value, int(v + divisor / 2) // divisor * divisor)
    if new_v < 0.9 * v:
        new_v += divisor
    return new_v


def _fold_bn(gamma, beta, mean, var, eps=EPS):
    scale = gamma / jnp.sqrt(var + eps)
    bias = beta - mean * scale
    return scale, bias


def _compiler_params(block_elems, scratch_elems=0):
    # double-buffered in/out blocks + scratch, f32, plus margin
    est = 4 * (2 * block_elems + scratch_elems) + (1 << 20)
    limit = int(min(64 << 20, max(16 << 20, est)))
    return pltpu.CompilerParams(dimension_semantics=("parallel",),
                                vmem_limit_bytes=limit)


# ----------------------------------------------------------------------------
# kernel 1: pointwise conv (one matmul) + folded BN (+ ReLU6)
# ----------------------------------------------------------------------------
def _make_pw_kernel(relu6):
    def kernel(x_ref, w_ref, s_ref, b_ref, o_ref):
        y = jnp.dot(x_ref[...], w_ref[...],
                    preferred_element_type=jnp.float32)
        y = y * s_ref[...] + b_ref[...]
        if relu6:
            y = jnp.clip(y, 0.0, 6.0)
        o_ref[...] = y.astype(o_ref.dtype)
    return kernel


def _pointwise(x_flat, w, scale, bias, *, relu6, tm_max=512):
    """(M, Cin) @ (Cin, Cout) with folded BN scale/bias (+ReLU6)."""
    m, cin = x_flat.shape
    cout = w.shape[1]
    tm = m if m <= tm_max else tm_max
    grid = (pl.cdiv(m, tm),)
    block_elems = tm * cin + cin * cout + 2 * cout + tm * cout
    return pl.pallas_call(
        _make_pw_kernel(relu6),
        out_shape=jax.ShapeDtypeStruct((m, cout), jnp.float32),
        grid_spec=pltpu.PrefetchScalarGridSpec(
            num_scalar_prefetch=0,
            grid=grid,
            in_specs=[
                pl.BlockSpec((tm, cin), lambda i: (i, 0)),
                pl.BlockSpec((cin, cout), lambda i: (0, 0)),
                pl.BlockSpec((1, cout), lambda i: (0, 0)),
                pl.BlockSpec((1, cout), lambda i: (0, 0)),
            ],
            out_specs=pl.BlockSpec((tm, cout), lambda i: (i, 0)),
        ),
        compiler_params=_compiler_params(block_elems),
    )(x_flat, w, scale.reshape(1, cout), bias.reshape(1, cout))


# ----------------------------------------------------------------------------
# kernel 2: fused stride-1 InvertedResidual
#   expand(1x1) + BN + ReLU6 -> depthwise 3x3 + BN + ReLU6 -> project(1x1)
#   + BN (+ residual), all in one kernel, per batch element.
# ----------------------------------------------------------------------------
def _make_ir_s1_kernel(H, W, cin, cmid, cout, has_expand, has_res):
    M = H * W

    def kernel(*refs):
        if has_expand:
            (x_ref, we_ref, se_ref, be_ref, wd_ref, sd_ref, bd_ref,
             wp_ref, sp_ref, bp_ref, o_ref, mid_ref) = refs
        else:
            (x_ref, wd_ref, sd_ref, bd_ref, wp_ref, sp_ref, bp_ref,
             o_ref, mid_ref) = refs

        x = x_ref[0]                                        # (H, W, cin)

        # -- expand 1x1 conv: single MXU matmul (K = cin) + BN + ReLU6 --
        if has_expand:
            y = jnp.dot(x.reshape(M, cin), we_ref[...],
                        preferred_element_type=jnp.float32)
            y = jnp.clip(y * se_ref[...] + be_ref[...], 0.0, 6.0)
            y = y.reshape(H, W, cmid)
        else:
            y = x                                           # cmid == cin

        # -- zero ONLY the 1-px halo of the scratch, then write the interior --
        mid_ref[0:1, :, :] = jnp.zeros((1, W + 2, cmid), jnp.float32)
        mid_ref[H + 1:H + 2, :, :] = jnp.zeros((1, W + 2, cmid), jnp.float32)
        mid_ref[:, 0:1, :] = jnp.zeros((H + 2, 1, cmid), jnp.float32)
        mid_ref[:, W + 1:W + 2, :] = jnp.zeros((H + 2, 1, cmid), jnp.float32)
        mid_ref[1:H + 1, 1:W + 1, :] = y

        # -- depthwise 3x3 'same': VPU tap accumulation, stays in (H, W, C) --
        acc = jnp.zeros((H, W, cmid), jnp.float32)
        for ky in range(3):
            for kx in range(3):
                acc = acc + (mid_ref[ky:ky + H, kx:kx + W, :]
                             * wd_ref[ky * 3 + kx])
        z = jnp.clip(acc * sd_ref[...] + bd_ref[...], 0.0, 6.0)

        # -- project 1x1 conv: single MXU matmul (K = cmid) + BN (+residual) --
        o = jnp.dot(z.reshape(M, cmid), wp_ref[...],
                    preferred_element_type=jnp.float32)
        o = o * sp_ref[...] + bp_ref[...]
        if has_res:
            o = o + x.reshape(M, cin)
        o_ref[...] = o.reshape(1, H, W, cout).astype(o_ref.dtype)

    return kernel


def _inverted_residual_s1(x_nhwc, lp):
    n, h, w, cin = x_nhwc.shape
    cmid, cout = lp["cmid"], lp["cout"]
    has_expand = lp["t"] != 1
    has_res = cin == cout

    in_specs = [pl.BlockSpec((1, h, w, cin), lambda i: (i, 0, 0, 0))]
    args = [x_nhwc]
    block_elems = h * w * (cin + cout)

    if has_expand:
        we = jnp.transpose(lp["exp_w"][:, :, 0, 0])          # (cin, cmid)
        se, be = _fold_bn(lp["exp_g"], lp["exp_b"], lp["exp_m"], lp["exp_v"])
        in_specs += [pl.BlockSpec((cin, cmid), lambda i: (0, 0)),
                     pl.BlockSpec((1, cmid), lambda i: (0, 0)),
                     pl.BlockSpec((1, cmid), lambda i: (0, 0))]
        args += [we, se.reshape(1, cmid), be.reshape(1, cmid)]
        block_elems += cin * cmid + 2 * cmid

    wd = jnp.transpose(lp["dw_w"], (2, 3, 1, 0)).reshape(9, 1, cmid)
    sd, bd = _fold_bn(lp["dw_g"], lp["dw_b"], lp["dw_m"], lp["dw_v"])
    wp = jnp.transpose(lp["proj_w"][:, :, 0, 0])             # (cmid, cout)
    sp, bp = _fold_bn(lp["proj_g"], lp["proj_b"], lp["proj_m"], lp["proj_v"])
    in_specs += [pl.BlockSpec((9, 1, cmid), lambda i: (0, 0, 0)),
                 pl.BlockSpec((1, cmid), lambda i: (0, 0)),
                 pl.BlockSpec((1, cmid), lambda i: (0, 0)),
                 pl.BlockSpec((cmid, cout), lambda i: (0, 0)),
                 pl.BlockSpec((1, cout), lambda i: (0, 0)),
                 pl.BlockSpec((1, cout), lambda i: (0, 0))]
    args += [wd, sd.reshape(1, cmid), bd.reshape(1, cmid),
             wp, sp.reshape(1, cout), bp.reshape(1, cout)]
    block_elems += 9 * cmid + 2 * cmid + cmid * cout + 2 * cout

    scratch_elems = (h + 2) * (w + 2) * cmid

    return pl.pallas_call(
        _make_ir_s1_kernel(h, w, cin, cmid, cout, has_expand, has_res),
        out_shape=jax.ShapeDtypeStruct((n, h, w, cout), jnp.float32),
        grid_spec=pltpu.PrefetchScalarGridSpec(
            num_scalar_prefetch=0,
            grid=(n,),
            in_specs=in_specs,
            out_specs=pl.BlockSpec((1, h, w, cout), lambda i: (i, 0, 0, 0)),
            scratch_shapes=[pltpu.VMEM((h + 2, w + 2, cmid), jnp.float32)],
        ),
        compiler_params=_compiler_params(block_elems, scratch_elems),
    )(*args)


# ----------------------------------------------------------------------------
# kernel 3: depthwise 3x3 for stride-2 blocks
#   PyTorch does F.pad(x, (0,1,0,1)) then k=3, s=2, pad=0.  We build the
#   bottom/right zero halo in VMEM, compute the stride-1 'valid' depthwise
#   output + BN + ReLU6, and subsample [::2, ::2] in the wrapper.
# ----------------------------------------------------------------------------
def _make_dw_s2_kernel(H, W, C):
    Ho, Wo = H - 1, W - 1

    def kernel(x_ref, wd_ref, s_ref, b_ref, o_ref, pad_ref):
        pad_ref[H:H + 1, :, :] = jnp.zeros((1, W + 1, C), jnp.float32)
        pad_ref[:, W:W + 1, :] = jnp.zeros((H + 1, 1, C), jnp.float32)
        pad_ref[0:H, 0:W, :] = x_ref[0]

        acc = jnp.zeros((Ho, Wo, C), jnp.float32)
        for ky in range(3):
            for kx in range(3):
                acc = acc + (pad_ref[ky:ky + Ho, kx:kx + Wo, :]
                             * wd_ref[ky * 3 + kx])
        o = jnp.clip(acc * s_ref[...] + b_ref[...], 0.0, 6.0)
        o_ref[...] = o[None].astype(o_ref.dtype)

    return kernel


def _depthwise_s2(x_nhwc, wd, sd, bd):
    n, h, w, c = x_nhwc.shape
    ho, wo = h - 1, w - 1
    out_full = pl.pallas_call(
        _make_dw_s2_kernel(h, w, c),
        out_shape=jax.ShapeDtypeStruct((n, ho, wo, c), jnp.float32),
        grid_spec=pltpu.PrefetchScalarGridSpec(
            num_scalar_prefetch=0,
            grid=(n,),
            in_specs=[pl.BlockSpec((1, h, w, c), lambda i: (i, 0, 0, 0)),
                      pl.BlockSpec((9, 1, c), lambda i: (0, 0, 0)),
                      pl.BlockSpec((1, c), lambda i: (0, 0)),
                      pl.BlockSpec((1, c), lambda i: (0, 0))],
            out_specs=pl.BlockSpec((1, ho, wo, c), lambda i: (i, 0, 0, 0)),
            scratch_shapes=[pltpu.VMEM((h + 1, w + 1, c), jnp.float32)],
        ),
        compiler_params=_compiler_params(
            h * w * c + ho * wo * c + 11 * c, (h + 1) * (w + 1) * c),
    )(x_nhwc, wd, sd.reshape(1, c), bd.reshape(1, c))
    # TODO(synk): an in-kernel strided store would avoid the ~4x depthwise
    # overcompute at real resolutions; acceptable for the 3 stride-2 blocks.
    return out_full[:, ::2, ::2, :]


def _inverted_residual_s2(x_nhwc, lp):
    n, h, w, cin = x_nhwc.shape
    cmid, cout = lp["cmid"], lp["cout"]

    hbuf = x_nhwc
    if lp["t"] != 1:
        we = jnp.transpose(lp["exp_w"][:, :, 0, 0])
        se, be = _fold_bn(lp["exp_g"], lp["exp_b"], lp["exp_m"], lp["exp_v"])
        hbuf = _pointwise(x_nhwc.reshape(n * h * w, cin), we, se, be,
                          relu6=True).reshape(n, h, w, cmid)

    wd = jnp.transpose(lp["dw_w"], (2, 3, 1, 0)).reshape(9, 1, cmid)
    sd, bd = _fold_bn(lp["dw_g"], lp["dw_b"], lp["dw_m"], lp["dw_v"])
    hbuf = _depthwise_s2(hbuf, wd, sd, bd)

    no, ho, wo, _ = hbuf.shape
    wp = jnp.transpose(lp["proj_w"][:, :, 0, 0])
    sp, bp = _fold_bn(lp["proj_g"], lp["proj_b"], lp["proj_m"], lp["proj_v"])
    return _pointwise(hbuf.reshape(no * ho * wo, cmid), wp, sp, bp,
                      relu6=False).reshape(no, ho, wo, cout)


# ----------------------------------------------------------------------------
# stem: 3x3 stride-2 conv (4 -> 32) as ONE matmul with K = 9*Cin = 36
# ----------------------------------------------------------------------------
def _stem(x_nhwc, p0):
    n, h, w, cin = x_nhwc.shape
    cout = p0["cout"]
    ho = (h - 2) // 2 + 1
    wo = (w - 2) // 2 + 1
    # F.pad(x, (0,1,0,1)): tiny 4-channel input, so the wrapper-side im2col +
    # stride subsample is cheap and lets the kernel run one fused matmul.
    xp = jnp.pad(x_nhwc, ((0, 0), (0, 1), (0, 1), (0, 0)))
    taps = [xp[:, ky::2, kx::2, :][:, :ho, :wo, :]
            for ky in range(3) for kx in range(3)]
    patches = jnp.concatenate(taps, axis=-1)                # (n, ho, wo, 9*cin)
    wmat = jnp.transpose(p0["conv_w"], (2, 3, 1, 0)).reshape(9 * cin, cout)
    s, b = _fold_bn(p0["conv_g"], p0["conv_b"], p0["conv_m"], p0["conv_v"])
    out = _pointwise(patches.reshape(n * ho * wo, 9 * cin), wmat, s, b,
                     relu6=True)
    return out.reshape(n, ho, wo, cout)


# ----------------------------------------------------------------------------
# full forward (NCHW in / NCHW FPN outputs, matching the PyTorch module)
# ----------------------------------------------------------------------------
def mobilenet_v2_forward(x_nchw, params):
    x = jnp.transpose(x_nchw, (0, 2, 3, 1)).astype(jnp.float32)   # NHWC
    x = _stem(x, params[0])                                       # feature 0
    outs = []
    for idx, lp in enumerate(params[1:], start=1):
        if idx > _FPN_SELECTED[-1]:
            break
        if lp["stride"] == 1:
            x = _inverted_residual_s1(x, lp)
        else:
            x = _inverted_residual_s2(x, lp)
        if idx in _FPN_SELECTED:
            outs.append(jnp.transpose(x, (0, 3, 1, 2)))
    return tuple(outs)


# ----------------------------------------------------------------------------
# pure-JAX (XLA) reference, mirrors the PyTorch module in eval mode
# ----------------------------------------------------------------------------
def _bn_ref(x, g, b, m, v, eps=EPS):
    inv = 1.0 / jnp.sqrt(v + eps)
    return ((x - m[None, :, None, None]) * inv[None, :, None, None]
            * g[None, :, None, None] + b[None, :, None, None])


def _conv_ref(x, w, stride, groups, pad):
    return lax.conv_general_dilated(
        x, w, window_strides=(stride, stride),
        padding=[(pad, pad), (pad, pad)],
        dimension_numbers=("NCHW", "OIHW", "NCHW"),
        feature_group_count=groups,
        precision=lax.Precision.HIGHEST)


def _conv_bn_relu6_ref(x, w, g, b, m, v, stride, groups, ksize):
    if stride == 2:
        x = jnp.pad(x, ((0, 0), (0, 0), (0, 1), (0, 1)))
        pad = 0
    else:
        pad = (ksize - 1) // 2
    y = _conv_ref(x, w, stride, groups, pad)
    return jnp.clip(_bn_ref(y, g, b, m, v), 0.0, 6.0)


def _reference_forward(x_nchw, params):
    p0 = params[0]
    x = _conv_bn_relu6_ref(x_nchw, p0["conv_w"], p0["conv_g"], p0["conv_b"],
                           p0["conv_m"], p0["conv_v"], 2, 1, 3)
    outs = []
    for idx, lp in enumerate(params[1:], start=1):
        inp = x
        h = x
        if lp["t"] != 1:
            h = _conv_bn_relu6_ref(h, lp["exp_w"], lp["exp_g"], lp["exp_b"],
                                   lp["exp_m"], lp["exp_v"], 1, 1, 1)
        h = _conv_bn_relu6_ref(h, lp["dw_w"], lp["dw_g"], lp["dw_b"],
                               lp["dw_m"], lp["dw_v"], lp["stride"],
                               lp["cmid"], 3)
        h = _conv_ref(h, lp["proj_w"], 1, 1, 0)
        h = _bn_ref(h, lp["proj_g"], lp["proj_b"], lp["proj_m"], lp["proj_v"])
        if lp["stride"] == 1 and lp["cin"] == lp["cout"]:
            h = h + inp
        x = h
        if idx in _FPN_SELECTED:
            outs.append(x)
    return tuple(outs)


# ----------------------------------------------------------------------------
# config + parameter init (matches the PyTorch MobileNetV2 construction)
# ----------------------------------------------------------------------------
def _layer_configs():
    cfgs = [dict(type="stem", cin=4, cout=32, stride=2)]
    settings = [[1, 16, 1, 1], [6, 24, 2, 2], [6, 32, 3, 2],
                [6, 64, 4, 2], [6, 96, 3, 1]]
    input_channel = _make_divisible(32 * 1.0, 8)
    for t, c, n, s in settings:
        output_channel = _make_divisible(c * 1.0, 8)
        for i in range(n):
            stride = s if i == 0 else 1
            cmid = int(round(input_channel * t))
            cfgs.append(dict(type="ir", cin=input_channel, cout=output_channel,
                             cmid=cmid, stride=stride, t=t))
            input_channel = output_channel
    return cfgs


def _init_bn(key, c, prefix, out):
    k1, k2, k3, k4 = jax.random.split(key, 4)
    out[prefix + "_g"] = 1.0 + 0.1 * jax.random.normal(k1, (c,), jnp.float32)
    out[prefix + "_b"] = 0.1 * jax.random.normal(k2, (c,), jnp.float32)
    out[prefix + "_m"] = 0.1 * jax.random.normal(k3, (c,), jnp.float32)
    out[prefix + "_v"] = 0.5 + jax.random.uniform(k4, (c,), jnp.float32)


def _init_params(key):
    params = []
    for cfg in _layer_configs():
        key, *ks = jax.random.split(key, 8)
        lp = dict(cfg)
        if cfg["type"] == "stem":
            cin, cout = cfg["cin"], cfg["cout"]
            lp["conv_w"] = (jax.random.normal(ks[0], (cout, cin, 3, 3),
                                              jnp.float32)
                            / (3.0 * cin ** 0.5))
            _init_bn(ks[1], cout, "conv", lp)
        else:
            cin, cmid, cout = cfg["cin"], cfg["cmid"], cfg["cout"]
            if cfg["t"] != 1:
                lp["exp_w"] = (jax.random.normal(ks[0], (cmid, cin, 1, 1),
                                                 jnp.float32) / (cin ** 0.5))
                _init_bn(ks[1], cmid, "exp", lp)
            lp["dw_w"] = (jax.random.normal(ks[2], (cmid, 1, 3, 3),
                                            jnp.float32) / 3.0)
            _init_bn(ks[3], cmid, "dw", lp)
            lp["proj_w"] = (jax.random.normal(ks[4], (cout, cmid, 1, 1),
                                              jnp.float32) / (cmid ** 0.5))
            _init_bn(ks[5], cout, "proj", lp)
        params.append(lp)
    return params


if __name__ == "__main__":
    key = jax.random.PRNGKey(0)
    k_x, k_p = jax.random.split(key)

    N, C_IN, H, W = 2, 4, 16, 16
    x = jax.random.normal(k_x, (N, C_IN, H, W), jnp.float32)
    params = _init_params(k_p)

    outs = jax.block_until_ready(mobilenet_v2_forward(x, params))
    refs = jax.block_until_ready(_reference_forward(x, params))

    expected_shapes = [(N, 16, 8, 8), (N, 24, 4, 4), (N, 32, 2, 2),
                       (N, 64, 1, 1), (N, 96, 1, 1)]
    assert len(outs) == 5 and len(refs) == 5
    for o, r, es in zip(outs, refs, expected_shapes):
        assert o.shape == es, (o.shape, es)
        assert r.shape == es, (r.shape, es)
        err = float(jnp.max(jnp.abs(o - r)))
        assert jnp.allclose(o, r, rtol=5e-3, atol=5e-3), err

    print("KERNEL_OK")
</pallas_src>

<mosaic_0001>
module attributes {stable_mosaic.version = 11 : i64} {
  func.func @kernel(%arg0: i32, %arg1: memref<128x36xf32, #tpu.memory_space<vmem>>, %arg2: memref<36x32xf32, #tpu.memory_space<vmem>>, %arg3: memref<1x32xf32, #tpu.memory_space<vmem>>, %arg4: memref<1x32xf32, #tpu.memory_space<vmem>>, %arg5: memref<128x32xf32, #tpu.memory_space<vmem>>) attributes {dimension_semantics = [#tpu.dimension_semantics<parallel>], iteration_bounds = array<i64: 1>, scalar_prefetch = 0 : i64, scratch_operands = 0 : i64, tpu.core_type = #tpu.core_type<tc>, window_params = [{transform_indices = @transform_0, window_bounds = array<i64: 128, 36>}, {pipeline_mode = #tpu.pipeline_mode<synchronous>, transform_indices = @transform_1, window_bounds = array<i64: 36, 32>}, {pipeline_mode = #tpu.pipeline_mode<synchronous>, transform_indices = @transform_2, window_bounds = array<i64: 1, 32>}, {pipeline_mode = #tpu.pipeline_mode<synchronous>, transform_indices = @transform_3, window_bounds = array<i64: 1, 32>}, {transform_indices = @transform_4, window_bounds = array<i64: 128, 32>}]} {
    %c0 = arith.constant 0 : index
    %c0_0 = arith.constant 0 : index
    %0 = vector.load %arg1[%c0, %c0_0] : memref<128x36xf32, #tpu.memory_space<vmem>>, vector<128x36xf32>
    %c0_1 = arith.constant 0 : index
    %c0_2 = arith.constant 0 : index
    %1 = vector.load %arg2[%c0_1, %c0_2] : memref<36x32xf32, #tpu.memory_space<vmem>>, vector<36x32xf32>
    %cst = arith.constant dense<0.000000e+00> : vector<128x32xf32>
    %2 = tpu.matmul %0, %1, %cst {dimension_numbers = #tpu.dot_dimension_numbers<[1], [0], [0], [1], [0, 0, 1, 1], [], []>} : vector<128x36xf32>, vector<36x32xf32>, vector<128x32xf32> -> vector<128x32xf32>
    %c0_3 = arith.constant 0 : index
    %c0_4 = arith.constant 0 : index
    %3 = vector.load %arg3[%c0_3, %c0_4] : memref<1x32xf32, #tpu.memory_space<vmem>>, vector<1x32xf32>
    %4 = vector.broadcast %3 : vector<1x32xf32> to vector<128x32xf32>
    %5 = arith.mulf %2, %4 : vector<128x32xf32>
    %c0_5 = arith.constant 0 : index
    %c0_6 = arith.constant 0 : index
    %6 = vector.load %arg4[%c0_5, %c0_6] : memref<1x32xf32, #tpu.memory_space<vmem>>, vector<1x32xf32>
    %7 = vector.broadcast %6 : vector<1x32xf32> to vector<128x32xf32>
    %8 = arith.addf %5, %7 : vector<128x32xf32>
    %cst_7 = arith.constant 0.000000e+00 : f32
    %cst_8 = arith.constant 6.000000e+00 : f32
    %9 = vector.broadcast %cst_7 : f32 to vector<128x32xf32>
    %10 = arith.maximumf %9, %8 : vector<128x32xf32>
    %11 = vector.broadcast %cst_8 : f32 to vector<128x32xf32>
    %12 = arith.minimumf %11, %10 : vector<128x32xf32>
    %c0_9 = arith.constant 0 : index
    %c0_10 = arith.constant 0 : index
    %13 = vector.load %arg5[%c0_9, %c0_10] : memref<128x32xf32, #tpu.memory_space<vmem>>, vector<128x32xf32>
    tpu.vector_store %arg5[%c0_9, %c0_10], %12 {strides = array<i32>} : memref<128x32xf32, #tpu.memory_space<vmem>>, vector<128x32xf32>,
    return
  }
  func.func @transform_0(%arg0: i32) -> (i32, i32) {
    %c0_i32 = arith.constant 0 : i32
    %c0_i32_0 = arith.constant 0 : i32
    return %arg0, %c0_i32 : i32, i32
  }
  func.func @transform_1(%arg0: i32) -> (i32, i32) {
    %c0_i32 = arith.constant 0 : i32
    %c0_i32_0 = arith.constant 0 : i32
    %c0_i32_1 = arith.constant 0 : i32
    return %c0_i32, %c0_i32_0 : i32, i32
  }
  func.func @transform_2(%arg0: i32) -> (i32, i32) {
    %c0_i32 = arith.constant 0 : i32
    %c0_i32_0 = arith.constant 0 : i32
    %c0_i32_1 = arith.constant 0 : i32
    return %c0_i32, %c0_i32_0 : i32, i32
  }
  func.func @transform_3(%arg0: i32) -> (i32, i32) {
    %c0_i32 = arith.constant 0 : i32
    %c0_i32_0 = arith.constant 0 : i32
    %c0_i32_1 = arith.constant 0 : i32
    return %c0_i32, %c0_i32_0 : i32, i32
  }
  func.func @transform_4(%arg0: i32) -> (i32, i32) {
    %c0_i32 = arith.constant 0 : i32
    %c0_i32_0 = arith.constant 0 : i32
    return %arg0, %c0_i32 : i32, i32
  }
}

</mosaic_0001>

<bundles_post_ra>
// kernel: tpu_custom_call.1
= control target key start
LH: loop header
LB: loop body
LE: loop exit
PB: predicated region body
PF: predicated region fallthrough
CT: control target
= control target key end

     0   :  { %vm87_vm0 = vcmask 1043456   ;;  %vm38_vm1 = vcmask 293888   ;;  %vm314_vm2 = vcmask 261120   ;;  %s629_s1 = inlined_call_operand.vmem [shape: f32[36,32], index: 1, kind: input, shape index: {}]   ;;  %s630_s0 = inlined_call_operand.vmem [shape: f32[128,36], index: 0, kind: input, shape index: {}]   ;;  %s631_s2 = inlined_call_operand.vmem [shape: f32[1,32], index: 2, kind: input, shape index: {}]   ;;  %s632_s3 = inlined_call_operand.vmem [shape: f32[1,32], index: 3, kind: input, shape index: {}]   ;;  %s633_s4 = inlined_call_operand.vmem [shape: f32[128,32], index: 4, kind: output, shape index: {}]  }
   0x1   :  { %v37_v0 = vld [vmem:[%s629_s1 + $0x20] sm:$0xf]  ;;  %v36_v1 = vld [vmem:[%s629_s1 + $0x18] sm:$0xff]  ;;  %v35_v2 = vld [vmem:[%s629_s1 + $0x10] sm:$0xff] }
   0x2   :  { %375 = vmatprep.subr.msk.mxu0 %vm87_vm0, %v37_v0  ;;  %409 = vmatprep.subr.msk.mxu1 %vm87_vm0, %v37_v0  ;;  %v34_v3 = vld [vmem:[%s629_s1 + $0x8] sm:$0xff]  ;;  %v33_v4 = vld [vmem:[%s629_s1] sm:$0xff]  ;;  %v19_v9 = vld [vmem:[%s630_s0 + $0x10] sm:$0xff] }
   0x3   :  { %376 = vmatpush3.msk.msra.mxu0 %vm87_vm0, %v37_v0  ;;  %414 = vmatpush3.msk.msra.mxu1 %vm87_vm0, %v37_v0  ;;  %v17_v5 = vld [vmem:[%s630_s0] sm:$0xff]  ;;  %v18_v7 = vld [vmem:[%s630_s0 + $0x8] sm:$0xff]  ;;  %v27_v10 = vld [vmem:[%s630_s0 + $0x50] sm:$0xff] }
   0x4   :  { %377 = vmatprep.subr.mxu0 %v36_v1  ;;  %410 = vmatprep.subr.mxu1 %v36_v1  ;;  %v25_v6 = vld [vmem:[%s630_s0 + $0x40] sm:$0xff]  ;;  %v26_v8 = vld [vmem:[%s630_s0 + $0x48] sm:$0xff]  ;;  %v20_v11 = vld [vmem:[%s630_s0 + $0x18] sm:$0xff] }
   0x5   :  { %378 = vmatpush3.msra.mxu0 %v36_v1  ;;  %415 = vmatpush3.msra.mxu1 %v36_v1  ;;  %v28_v12 = vld [vmem:[%s630_s0 + $0x58] sm:$0xff]  ;;  %v21_v13 = vld [vmem:[%s630_s0 + $0x20] sm:$0xff]  ;;  %v22_v15 = vld [vmem:[%s630_s0 + $0x28] sm:$0xff] }
   0x6   :  { %379 = vmatprep.subr.mxu0 %v35_v2  ;;  %411 = vmatprep.subr.mxu1 %v35_v2  ;;  %v29_v14 = vld [vmem:[%s630_s0 + $0x60] sm:$0xff]  ;;  %v30_v16 = vld [vmem:[%s630_s0 + $0x68] sm:$0xff]  ;;  %v23_v17 = vld [vmem:[%s630_s0 + $0x30] sm:$0xff] }
   0x7   :  { %380 = vmatpush3.msra.mxu0 %v35_v2  ;;  %416 = vmatpush3.msra.mxu1 %v35_v2  ;;  %v31_v18 = vld [vmem:[%s630_s0 + $0x70] sm:$0xff]  ;;  %v24_v19 = vld [vmem:[%s630_s0 + $0x38] sm:$0xff]  ;;  %v526_v21 = vld [vmem:[%s631_s2] ss:$0 sm:$0xff] }
   0x8   :  { %381 = vmatprep.subr.mxu0 %v34_v3  ;;  %412 = vmatprep.subr.mxu1 %v34_v3  ;;  %v32_v20 = vld [vmem:[%s630_s0 + $0x78] sm:$0xff]  ;;  %v531_v23 = vld [vmem:[%s632_s3] ss:$0 sm:$0xff] }
   0x9   :  { %382 = vmatpush3.msra.mxu0 %v34_v3  ;;  %417 = vmatpush3.msra.mxu1 %v34_v3 }
   0xa   :  { %383 = vmatprep.subr.mxu0 %v33_v4  ;;  %413 = vmatprep.subr.mxu1 %v33_v4 }
   0xb   :  { %384 = vmatpush3.msra.mxu0 %v33_v4  ;;  %418 = vmatpush3.msra.mxu1 %v33_v4 }
   0xc   :  { %385 = vmatprep.mubr.msk.f32.mxu0 %vm38_vm1, %v17_v5  ;;  %397 = vmatprep.mubr.msk.f32.mxu1 %vm38_vm1, %v25_v6 }
   0xd   :  { %386 = vmatmul.mubr.msk.f32.vlgmr.msra.gmra.mxu0 %vm38_vm1, %v18_v7  ;;  %398 = vmatmul.mubr.msk.f32.vlgmr.msra.gmra.mxu1 %vm38_vm1, %v26_v8 }
   0xe   :  { %388 = vmatprep.mubr.msk.f32.mxu0 %vm38_vm1, %v19_v9  ;;  %400 = vmatprep.mubr.msk.f32.mxu1 %vm38_vm1, %v27_v10 }
  0x11   :  { %389 = vmatmul.mubr.msk.f32.gmra.mxu0 %vm38_vm1, %v20_v11  ;;  %401 = vmatmul.mubr.msk.f32.gmra.mxu1 %vm38_vm1, %v28_v12 }
  0x12   :  { %391 = vmatprep.mubr.msk.f32.mxu0 %vm38_vm1, %v21_v13  ;;  %403 = vmatprep.mubr.msk.f32.mxu1 %vm38_vm1, %v29_v14 }
  0x15   :  { %392 = vmatmul.mubr.msk.f32.gmra.mxu0 %vm38_vm1, %v22_v15  ;;  %404 = vmatmul.mubr.msk.f32.gmra.mxu1 %vm38_vm1, %v30_v16 }
  0x16   :  { %394 = vmatprep.mubr.msk.f32.mxu0 %vm38_vm1, %v23_v17  ;;  %406 = vmatprep.mubr.msk.f32.mxu1 %vm38_vm1, %v31_v18 }
  0x19   :  { %395 = vmatmul.mubr.msk.f32.gmra.mxu0 %vm38_vm1, %v24_v19  ;;  %407 = vmatmul.mubr.msk.f32.gmra.mxu1 %vm38_vm1, %v32_v20 }
  0xcd   :  { %v387_v22 = vpop.f32.mrf.mxu0  ;;  %v399_v24 = vpop.f32.mrf.mxu1 }
  0xce   :  { %v244_v25 = vmul.f32 %v387_v22, %v526_v21  ;;  %v252_v26 = vmul.f32 %v399_v24, %v526_v21 }
  0xcf   :  { %v157_v27 = vpop.f32.mrf.mxu0  ;;  %v197_v28 = vpop.f32.mrf.mxu1 }
  0xd0   :  { %v267_v29 = vadd.f32 %v531_v23, %v244_v25  ;;  %v275_v30 = vadd.f32 %v531_v23, %v252_v26  ;;  %v243_v31 = vmul.f32 %v526_v21, %v157_v27  ;;  %v251_v32 = vmul.f32 %v526_v21, %v197_v28 }
  0xd1   :  { %v390_v33 = vpop.f32.mrf.mxu0  ;;  %v402_v34 = vpop.f32.mrf.mxu1 }
  0xd2   :  { %v283_v35 = vmax.f32 %v267_v29, 0.0  ;;  %v291_v36 = vmax.f32 %v275_v30, 0.0  ;;  %v266_v37 = vadd.f32 %v531_v23, %v243_v31  ;;  %v274_v38 = vadd.f32 %v531_v23, %v251_v32 }
  0xd3   :  { %v246_v39 = vmul.f32 %v390_v33, %v526_v21  ;;  %v254_v40 = vmul.f32 %v402_v34, %v526_v21  ;;  %v167_v41 = vpop.f32.mrf.mxu0  ;;  %v207_v42 = vpop.f32.mrf.mxu1 }
  0xd4   :  { %v299_v43 = vmin.f32 %v283_v35, 6.0  ;;  %v307_v44 = vmin.f32 %v291_v36, 6.0  ;;  %v282_v45 = vmax.f32 %v266_v37, 0.0  ;;  %v290_v46 = vmax.f32 %v274_v38, 0.0 }
  0xd5   :  { %v269_v47 = vadd.f32 %v531_v23, %v246_v39  ;;  %v277_v48 = vadd.f32 %v531_v23, %v254_v40  ;;  %v245_v49 = vmul.f32 %v526_v21, %v167_v41  ;;  %v253_v50 = vmul.f32 %v526_v21, %v207_v42  ;;  %v393_v51 = vpop.f32.mrf.mxu0  ;;  %v405_v52 = vpop.f32.mrf.mxu1 }
  0xd6   :  { %316 = vst.msk [vmem:[%s633_s4 + $0x8] sm:$0xff] %vm314_vm2, %v299_v43  ;;  %324 = vst.msk [vmem:[%s633_s4 + $0x48] sm:$0xff] %vm314_vm2, %v307_v44  ;;  %v298_v53 = vmin.f32 %v282_v45, 6.0  ;;  %v306_v54 = vmin.f32 %v290_v46, 6.0  ;;  %v248_v55 = vmul.f32 %v393_v51, %v526_v21  ;;  %v256_v56 = vmul.f32 %v405_v52, %v526_v21 }
  0xd7   :  { %v285_v57 = vmax.f32 %v269_v47, 0.0  ;;  %v293_v58 = vmax.f32 %v277_v48, 0.0  ;;  %v268_v59 = vadd.f32 %v531_v23, %v245_v49  ;;  %v276_v60 = vadd.f32 %v531_v23, %v253_v50  ;;  %v177_v61 = vpop.f32.mrf.mxu0  ;;  %v217_v62 = vpop.f32.mrf.mxu1 }
  0xd8   :  { %315 = vst.msk [vmem:[%s633_s4] sm:$0xff] %vm314_vm2, %v298_v53  ;;  %323 = vst.msk [vmem:[%s633_s4 + $0x40] sm:$0xff] %vm314_vm2, %v306_v54  ;;  %v271_v63 = vadd.f32 %v531_v23, %v248_v55  ;;  %v279_v0 = vadd.f32 %v531_v23, %v256_v56  ;;  %v247_v1 = vmul.f32 %v526_v21, %v177_v61 }
  0xd9   :  { %v255_v2 = vmul.f32 %v526_v21, %v217_v62  ;;  %v301_v3 = vmin.f32 %v285_v57, 6.0  ;;  %v309_v4 = vmin.f32 %v293_v58, 6.0  ;;  %v284_v5 = vmax.f32 %v268_v59, 0.0  ;;  %v396_v7 = vpop.f32.mrf.mxu0  ;;  %v408_v8 = vpop.f32.mrf.mxu1 }
  0xda   :  { %v292_v6 = vmax.f32 %v276_v60, 0.0  ;;  %v287_v9 = vmax.f32 %v271_v63, 0.0  ;;  %v295_v10 = vmax.f32 %v279_v0, 0.0  ;;  %v270_v11 = vadd.f32 %v531_v23, %v247_v1 }
  0xdb   :  { %v278_v12 = vadd.f32 %v531_v23, %v255_v2  ;;  %318 = vst.msk [vmem:[%s633_s4 + $0x18] sm:$0xff] %vm314_vm2, %v301_v3  ;;  %326 = vst.msk [vmem:[%s633_s4 + $0x58] sm:$0xff] %vm314_vm2, %v309_v4  ;;  %v300_v13 = vmin.f32 %v284_v5, 6.0  ;;  %v250_v15 = vmul.f32 %v396_v7, %v526_v21  ;;  %v258_v16 = vmul.f32 %v408_v8, %v526_v21  ;;  %v187_v17 = vpop.f32.mrf.mxu0  ;;  %v227_v18 = vpop.f32.mrf.mxu1 }
  0xdc   :  { %v308_v14 = vmin.f32 %v292_v6, 6.0  ;;  %v303_v19 = vmin.f32 %v287_v9, 6.0  ;;  %v311_v20 = vmin.f32 %v295_v10, 6.0  ;;  %v286_v22 = vmax.f32 %v270_v11, 0.0 }
  0xdd   :  { %v294_v24 = vmax.f32 %v278_v12, 0.0  ;;  %317 = vst.msk [vmem:[%s633_s4 + $0x10] sm:$0xff] %vm314_vm2, %v300_v13  ;;  %v273_v25 = vadd.f32 %v531_v23, %v250_v15  ;;  %v281_v26 = vadd.f32 %v531_v23, %v258_v16  ;;  %v249_v27 = vmul.f32 %v526_v21, %v187_v17 }
  0xde   :  { %325 = vst.msk [vmem:[%s633_s4 + $0x50] sm:$0xff] %vm314_vm2, %v308_v14  ;;  %v257_v28 = vmul.f32 %v526_v21, %v227_v18  ;;  %320 = vst.msk [vmem:[%s633_s4 + $0x28] sm:$0xff] %vm314_vm2, %v303_v19  ;;  %v302_v29 = vmin.f32 %v286_v22, 6.0 }
  0xdf   :  { %328 = vst.msk [vmem:[%s633_s4 + $0x68] sm:$0xff] %vm314_vm2, %v311_v20  ;;  %v310_v30 = vmin.f32 %v294_v24, 6.0  ;;  %v289_v31 = vmax.f32 %v273_v25, 0.0  ;;  %v297_v32 = vmax.f32 %v281_v26, 0.0  ;;  %v272_v33 = vadd.f32 %v531_v23, %v249_v27 }
  0xe0   :  { %v280_v34 = vadd.f32 %v531_v23, %v257_v28  ;;  %319 = vst.msk [vmem:[%s633_s4 + $0x20] sm:$0xff] %vm314_vm2, %v302_v29 }
  0xe1   :  { %327 = vst.msk [vmem:[%s633_s4 + $0x60] sm:$0xff] %vm314_vm2, %v310_v30  ;;  %v305_v21 = vmin.f32 %v289_v31, 6.0  ;;  %v313_v35 = vmin.f32 %v297_v32, 6.0  ;;  %v288_v36 = vmax.f32 %v272_v33, 0.0 }
  0xe2   :  { %v296_v37 = vmax.f32 %v280_v34, 0.0 }
  0xe3   :  { %322 = vst.msk [vmem:[%s633_s4 + $0x38] sm:$0xff] %vm314_vm2, %v305_v21  ;;  %330 = vst.msk [vmem:[%s633_s4 + $0x78] sm:$0xff] %vm314_vm2, %v313_v35  ;;  %v304_v23 = vmin.f32 %v288_v36, 6.0 }
  0xe4   :  { %v312_v38 = vmin.f32 %v296_v37, 6.0 }
  0xe5   :  { %321 = vst.msk [vmem:[%s633_s4 + $0x30] sm:$0xff] %vm314_vm2, %v304_v23 }
  0xe6   :  { %329 = vst.msk [vmem:[%s633_s4 + $0x70] sm:$0xff] %vm314_vm2, %v312_v38 }

</bundles_post_ra>
